<compile_context>
chip_gen: v6e
topology: v6e:2x2x1
jax: 0.10.0
libtpu: 0.0.40
codegen_flags: <defaults>
</compile_context>

<pallas_src>
import jax
import jax.numpy as jnp
from jax.experimental import pallas as pl
from jax.experimental.pallas import tpu as pltpu


def _round_up(x, m):
    return ((x + m - 1) // m) * m


def _vmem_capacity_bytes():
    """Physical VMEM per TensorCore (fallback: 128 MiB, the v5e/v6e size)."""
    try:
        return int(pltpu.get_tpu_info().vmem_capacity_bytes)
    except Exception:
        return 128 << 20


def _default_tiles():
    """(block_m, block_i) targets per TPU generation, keyed off VMEM capacity."""
    if _vmem_capacity_bytes() <= (64 << 20):     # v7x: 64 MiB per TensorCore
        return 512, 256
    return 768, 512                              # v5e / v6e: 128 MiB


def _pick_i_tile(total_i, target):
    """Largest divisor of total_i <= target that is a multiple of 128 (then 8),
    falling back to total_i."""
    if total_i <= target:
        return total_i
    for quantum in (128, 8):
        t = (target // quantum) * quantum
        while t >= quantum:
            if total_i % t == 0:
                return t
            t -= quantum
    return total_i


def pack_expert_weights(w_gate, w_up, w_down, *, block_i=None):
    """One-time (weight-load time) packing — hoisted out of the forward path.

    Fuses gate and up into a single [E, H, 2*I] array laid out so that the
    I-tile `i` occupies the contiguous slab [i*2*ti : (i+1)*2*ti] = [gate_i|up_i],
    and casts all expert weights to bf16.  Returns (w_gu, w_dn, ti).
    """
    E, H, I = w_gate.shape
    if block_i is None:
        _, block_i = _default_tiles()
    ti = _pick_i_tile(I, block_i)
    ni = I // ti
    w_gu = jnp.concatenate(
        [w_gate.reshape(E, H, ni, ti), w_up.reshape(E, H, ni, ti)], axis=-1
    ).reshape(E, H, 2 * I).astype(jnp.bfloat16)
    w_dn = w_down.astype(jnp.bfloat16)
    return w_gu, w_dn, ti


def _make_moe_kernel(ti):
    """Kernel closure over the static intermediate-tile size."""

    def kernel(te_ref, tv_ref, x_ref, dw_ref, wgu_ref, wd_ref, o_ref, acc_ref):
        i = pl.program_id(1)
        n_i = pl.num_programs(1)

        @pl.when(i == 0)
        def _():
            acc_ref[...] = jnp.zeros_like(acc_ref)

        # Trailing over-allocated tiles carry no routed rows: skip their MXU work.
        @pl.when(tv_ref[pl.program_id(0)] > 0)
        def _():
            x = x_ref[...]                                            # (TM, H) bf16
            gu = jnp.dot(x, wgu_ref[...],
                         preferred_element_type=jnp.float32)          # (TM, 2*TI) f32
            g = gu[:, :ti]
            u = gu[:, ti:]
            h = (g * jax.nn.sigmoid(g)) * u                           # silu(gate)*up
            h = h * dw_ref[...]                                       # fold top-k weight
            acc_ref[...] += jnp.dot(h.astype(wd_ref.dtype), wd_ref[...],
                                    preferred_element_type=jnp.float32)

        @pl.when(i == n_i - 1)
        def _():
            o_ref[...] = acc_ref[...].astype(o_ref.dtype)

    return kernel


def grpc_expert_forward(hidden_states, router_logits, w_gu, w_dn, ti, top_k,
                        *, block_m=None):
    """Pallas implementation of GrpcExpert.forward (local experts).

    hidden_states : [T, H]
    router_logits : [T, E]
    w_gu          : [E, H, 2*I]  (from pack_expert_weights, bf16)
    w_dn          : [E, I, H]    (from pack_expert_weights, bf16)
    ti            : intermediate tile used at pack time
    returns       : [T, H]
    """
    T, H = hidden_states.shape
    E = router_logits.shape[-1]
    I = w_dn.shape[1]
    K = top_k
    out_dtype = hidden_states.dtype
    assert w_gu.shape == (E, H, 2 * I) and I % ti == 0
    nI = I // ti

    if block_m is None:
        block_m, _ = _default_tiles()

    # ---- Routing (glue): raw-logit top-k, exactly as torch.topk. -------------
    vals, idx = jax.lax.top_k(router_logits, K)                       # [T, K]

    S = T * K
    TM = max(8, min(block_m, _round_up(S, 8)))                        # row tile (shrinks at decode)
    Lp = _round_up(S + min(E, S) * (TM - 1), TM)                      # static worst-case padded rows
    nM = Lp // TM

    # ---- Sort token-slots by expert; pad each expert group to TM rows. -------
    slot_expert = idx.reshape(S).astype(jnp.int32)
    slot_token = jnp.repeat(jnp.arange(T, dtype=jnp.int32), K)
    slot_weight = vals.reshape(S).astype(jnp.float32)

    order = jnp.argsort(slot_expert)                                  # stable
    sorted_expert = slot_expert[order]
    sorted_token = slot_token[order]
    sorted_weight = slot_weight[order]

    cnt = jnp.bincount(slot_expert, length=E).astype(jnp.int32)       # [E]
    padded_cnt = ((cnt + TM - 1) // TM) * TM
    group_start = jnp.cumsum(padded_cnt) - padded_cnt                 # exclusive cumsum
    total_padded = jnp.sum(padded_cnt)
    group_rank = jnp.arange(S, dtype=jnp.int32) - (jnp.cumsum(cnt) - cnt)[sorted_expert]
    dest = (group_start[sorted_expert] + group_rank).astype(jnp.int32)  # unique slot rows

    # Slot-major buffers: padding rows map to dummy token T with zero x / weight.
    src_tok = jnp.full((Lp,), T, jnp.int32).at[dest].set(sorted_token)
    x_pad = jnp.concatenate(
        [hidden_states.astype(jnp.bfloat16), jnp.zeros((1, H), jnp.bfloat16)], axis=0)
    x_slots = x_pad[src_tok]                                          # [Lp, H] bf16
    dw_slots = jnp.zeros((Lp, 1), jnp.float32).at[dest, 0].set(sorted_weight)

    # Per-row-tile metadata (scalar-prefetched into SMEM, drives weight DMAs).
    tile_start = jnp.arange(nM, dtype=jnp.int32) * TM
    cum_padded = jnp.cumsum(padded_cnt)
    tile_expert = jnp.minimum(
        jnp.searchsorted(cum_padded, tile_start, side="right"), E - 1).astype(jnp.int32)
    tile_valid = (tile_start < total_padded).astype(jnp.int32)

    # ---- VMEM budget (double-buffered IO + one f32 accumulator) & cost. ------
    cap = _vmem_capacity_bytes()
    w_tile_bytes = (H * 2 * ti + ti * H) * 2                          # bf16, one buffer
    io_tile_bytes = TM * H * 2 + TM * 4 + TM * H * 4                  # x + dw + out, one buffer
    est = 2 * (w_tile_bytes + io_tile_bytes) + TM * H * 4
    head = (16 << 20) if cap <= (64 << 20) else (28 << 20)
    limit_cap = max(cap - head, 32 << 20)                             # ~48 MiB v7x / ~100 MiB v5e,v6e
    vmem_limit = int(min(max(est + (8 << 20), 32 << 20), limit_cap))

    cost = pl.CostEstimate(
        flops=int(6 * Lp * H * I),
        transcendentals=int(Lp * I),
        bytes_accessed=int(nM * 6 * H * I                  # bf16 weights, streamed per row tile
                           + Lp * H * (2 + 4) + Lp * 4 + nM * 8),
    )

    y_slots = pl.pallas_call(
        _make_moe_kernel(ti),
        out_shape=jax.ShapeDtypeStruct((Lp, H), jnp.float32),
        grid_spec=pltpu.PrefetchScalarGridSpec(
            num_scalar_prefetch=2,
            grid=(nM, nI),
            in_specs=[
                pl.BlockSpec((TM, H), lambda m, i, te, tv: (m, 0)),                   # sorted tokens
                pl.BlockSpec((TM, 1), lambda m, i, te, tv: (m, 0)),                   # top-k weights
                pl.BlockSpec((None, H, 2 * ti), lambda m, i, te, tv: (te[m], 0, i)),  # gate|up
                pl.BlockSpec((None, ti, H), lambda m, i, te, tv: (te[m], i, 0)),      # down
            ],
            out_specs=pl.BlockSpec((TM, H), lambda m, i, te, tv: (m, 0)),
            scratch_shapes=[pltpu.VMEM((TM, H), jnp.float32)],
        ),
        compiler_params=pltpu.CompilerParams(
            dimension_semantics=("parallel", "arbitrary"),
            vmem_limit_bytes=vmem_limit,
        ),
        cost_estimate=cost,
    )(tile_expert, tile_valid, x_slots, dw_slots, w_gu, w_dn)

    # ---- Scatter-add slot outputs back to tokens (padding rows dropped). -----
    out = jax.ops.segment_sum(y_slots, src_tok, num_segments=T + 1)[:T]
    return out.astype(out_dtype)


def _reference_f32(hidden_states, router_logits, w_gate, w_up, w_down, top_k):
    """Pure-JAX f32 reference matching the PyTorch semantics."""
    vals, idx = jax.lax.top_k(router_logits, top_k)
    T = hidden_states.shape[0]

    def expert_all(wg, wu, wd):
        g = hidden_states @ wg
        u = hidden_states @ wu
        return (jax.nn.silu(g) * u) @ wd                               # [T, H]

    y_all = jax.vmap(expert_all)(w_gate, w_up, w_down)                 # [E, T, H]
    y_sel = y_all[idx, jnp.arange(T)[:, None], :]                      # [T, K, H]
    return jnp.sum(vals[..., None] * y_sel, axis=1)                    # [T, H]


def _reference_bf16(hidden_states, router_logits, w_gate, w_up, w_down, top_k):
    """Reference matching the kernel's bf16-in / f32-accumulate numerics
    (routing weight folded into h before the bf16 down-projection input)."""
    vals, idx = jax.lax.top_k(router_logits, top_k)
    T = hidden_states.shape[0]
    x = hidden_states.astype(jnp.bfloat16)

    def expert_h(wg, wu):
        g = jnp.dot(x, wg.astype(jnp.bfloat16), preferred_element_type=jnp.float32)
        u = jnp.dot(x, wu.astype(jnp.bfloat16), preferred_element_type=jnp.float32)
        return (g * jax.nn.sigmoid(g)) * u                             # [T, I] f32

    h_all = jax.vmap(expert_h)(w_gate, w_up)                           # [E, T, I]
    h_sel = h_all[idx, jnp.arange(T)[:, None], :]                      # [T, K, I]
    h_scaled = (h_sel * vals[..., None].astype(jnp.float32)).astype(jnp.bfloat16)
    wd_sel = w_down.astype(jnp.bfloat16)[idx]                          # [T, K, I, H]
    y = jnp.einsum("tki,tkih->tkh", h_scaled, wd_sel,
                   preferred_element_type=jnp.float32)                 # [T, K, H]
    return jnp.sum(y, axis=1)


if __name__ == "__main__":
    # Small shapes consistent with the module's forward:
    #   hidden_states [num_tokens, hidden], router_logits [num_tokens, num_experts]
    num_tokens = 8
    hidden_size = 128
    intermediate_size = 256
    num_experts = 8
    top_k = 2

    key = jax.random.PRNGKey(0)
    k_h, k_r, k_g, k_u, k_d = jax.random.split(key, 5)

    hidden_states = jax.random.normal(k_h, (num_tokens, hidden_size), jnp.float32)
    router_logits = jax.random.normal(k_r, (num_tokens, num_experts), jnp.float32)

    # Deterministic synthetic expert parameters (the "remote" experts).
    scale_in = 1.0 / jnp.sqrt(hidden_size)
    scale_mid = 1.0 / jnp.sqrt(intermediate_size)
    w_gate = jax.random.normal(
        k_g, (num_experts, hidden_size, intermediate_size), jnp.float32) * scale_in
    w_up = jax.random.normal(
        k_u, (num_experts, hidden_size, intermediate_size), jnp.float32) * scale_in
    w_down = jax.random.normal(
        k_d, (num_experts, intermediate_size, hidden_size), jnp.float32) * scale_mid

    # One-time weight packing (cached at weight-load time in a real server).
    # block_i=128 exercises the I-tiled accumulation path (nI=2) at toy sizes.
    w_gu, w_dn, ti = pack_expert_weights(w_gate, w_up, w_down, block_i=128)

    out = grpc_expert_forward(hidden_states, router_logits, w_gu, w_dn, ti, top_k,
                              block_m=64)
    out = jax.block_until_ready(out)
    assert out.shape == (num_tokens, hidden_size)

    ref16 = _reference_bf16(hidden_states, router_logits, w_gate, w_up, w_down, top_k)
    assert jnp.allclose(out, ref16, rtol=1e-2, atol=1e-2), "mismatch vs bf16 reference"

    ref32 = _reference_f32(hidden_states, router_logits, w_gate, w_up, w_down, top_k)
    assert jnp.allclose(out, ref32, rtol=5e-2, atol=5e-2), "mismatch vs f32 reference"

    print("KERNEL_OK")
</pallas_src>

<mosaic_0001>
module attributes {stable_mosaic.version = 11 : i64} {
  func.func @kernel(%arg0: i32, %arg1: i32, %arg2: memref<9xi32, #tpu.memory_space<smem>>, %arg3: memref<9xi32, #tpu.memory_space<smem>>, %arg4: memref<16x128xbf16, #tpu.memory_space<vmem>>, %arg5: memref<16x1xf32, #tpu.memory_space<vmem>>, %arg6: memref<1x128x256xbf16, #tpu.memory_space<vmem>>, %arg7: memref<1x128x128xbf16, #tpu.memory_space<vmem>>, %arg8: memref<16x128xf32, #tpu.memory_space<vmem>>, %arg9: memref<16x128xf32, #tpu.memory_space<vmem>>) attributes {dimension_semantics = [#tpu.dimension_semantics<parallel>, #tpu.dimension_semantics<arbitrary>], iteration_bounds = array<i64: 9, 2>, scalar_prefetch = 2 : i64, scratch_operands = 1 : i64, tpu.core_type = #tpu.core_type<tc>, window_params = [{transform_indices = @transform_0, window_bounds = array<i64: 16, 128>}, {transform_indices = @transform_1, window_bounds = array<i64: 16, 1>}, {transform_indices = @transform_2, window_bounds = array<i64: 1, 128, 256>}, {transform_indices = @transform_3, window_bounds = array<i64: 1, 128, 128>}, {transform_indices = @transform_4, window_bounds = array<i64: 16, 128>}]} {
    %c0_i32 = arith.constant 0 : i32
    %0 = arith.cmpi eq, %arg1, %c0_i32 : i32
    %1 = arith.extui %0 : i1 to i32
    %c0_i32_0 = arith.constant 0 : i32
    %2 = arith.cmpi ne, %1, %c0_i32_0 : i32
    scf.if %2 {
      %cst = arith.constant 0.000000e+00 : f32
      %11 = vector.broadcast %cst : f32 to vector<16x128xf32>
      %c0 = arith.constant 0 : index
      %c0_4 = arith.constant 0 : index
      %12 = vector.load %arg9[%c0, %c0_4] : memref<16x128xf32, #tpu.memory_space<vmem>>, vector<16x128xf32>
      tpu.vector_store %arg9[%c0, %c0_4], %11 {strides = array<i32>} : memref<16x128xf32, #tpu.memory_space<vmem>>, vector<16x128xf32>,
    } else {
    }
    %3 = arith.index_cast %arg0 : i32 to index
    %4 = memref.load %arg3[%3] : memref<9xi32, #tpu.memory_space<smem>>
    %c0_i32_1 = arith.constant 0 : i32
    %5 = arith.cmpi sgt, %4, %c0_i32_1 : i32
    %6 = arith.extui %5 : i1 to i32
    %c0_i32_2 = arith.constant 0 : i32
    %7 = arith.cmpi ne, %6, %c0_i32_2 : i32
    scf.if %7 {
      %c0 = arith.constant 0 : index
      %c0_4 = arith.constant 0 : index
      %11 = vector.load %arg4[%c0, %c0_4] : memref<16x128xbf16, #tpu.memory_space<vmem>>, vector<16x128xbf16>
      %c0_5 = arith.constant 0 : index
      %c0_6 = arith.constant 0 : index
      %c0_7 = arith.constant 0 : index
      %12 = vector.load %arg6[%c0_5, %c0_6, %c0_7] : memref<1x128x256xbf16, #tpu.memory_space<vmem>>, vector<1x128x256xbf16>
      %13 = vector.shape_cast %12 : vector<1x128x256xbf16> to vector<128x256xbf16>
      %cst = arith.constant dense<0.000000e+00> : vector<16x256xf32>
      %14 = tpu.matmul %11, %13, %cst {dimension_numbers = #tpu.dot_dimension_numbers<[1], [0], [0], [1], [0, 0, 1, 1], [], []>} : vector<16x128xbf16>, vector<128x256xbf16>, vector<16x256xf32> -> vector<16x256xf32>
      %15 = vector.extract_strided_slice %14 {offsets = [0, 0], sizes = [16, 128], strides = [1, 1]} : vector<16x256xf32> to vector<16x128xf32>
      %16 = vector.extract_strided_slice %14 {offsets = [0, 128], sizes = [16, 128], strides = [1, 1]} : vector<16x256xf32> to vector<16x128xf32>
      %17 = arith.negf %15 : vector<16x128xf32>
      %18 = math.exp %17 : vector<16x128xf32>
      %cst_8 = arith.constant 1.000000e+00 : f32
      %19 = vector.broadcast %cst_8 : f32 to vector<16x128xf32>
      %20 = arith.addf %19, %18 : vector<16x128xf32>
      %21 = arith.divf %19, %20 : vector<16x128xf32>
      %22 = arith.mulf %15, %21 : vector<16x128xf32>
      %23 = arith.mulf %22, %16 : vector<16x128xf32>
      %c0_9 = arith.constant 0 : index
      %c0_10 = arith.constant 0 : index
      %24 = vector.load %arg5[%c0_9, %c0_10] : memref<16x1xf32, #tpu.memory_space<vmem>>, vector<16x1xf32>
      %25 = vector.broadcast %24 : vector<16x1xf32> to vector<16x128xf32>
      %26 = arith.mulf %23, %25 : vector<16x128xf32>
      %c0_11 = arith.constant 0 : index
      %c0_12 = arith.constant 0 : index
      %27 = vector.load %arg9[%c0_11, %c0_12] : memref<16x128xf32, #tpu.memory_space<vmem>>, vector<16x128xf32>
      %28 = arith.truncf %26 : vector<16x128xf32> to vector<16x128xbf16>
      %c0_13 = arith.constant 0 : index
      %c0_14 = arith.constant 0 : index
      %c0_15 = arith.constant 0 : index
      %29 = vector.load %arg7[%c0_13, %c0_14, %c0_15] : memref<1x128x128xbf16, #tpu.memory_space<vmem>>, vector<1x128x128xbf16>
      %30 = vector.shape_cast %29 : vector<1x128x128xbf16> to vector<128x128xbf16>
      %cst_16 = arith.constant dense<0.000000e+00> : vector<16x128xf32>
      %31 = tpu.matmul %28, %30, %cst_16 {dimension_numbers = #tpu.dot_dimension_numbers<[1], [0], [0], [1], [0, 0, 1, 1], [], []>} : vector<16x128xbf16>, vector<128x128xbf16>, vector<16x128xf32> -> vector<16x128xf32>
      %32 = arith.addf %27, %31 : vector<16x128xf32>
      %c0_17 = arith.constant 0 : index
      %c0_18 = arith.constant 0 : index
      %33 = vector.load %arg9[%c0_17, %c0_18] : memref<16x128xf32, #tpu.memory_space<vmem>>, vector<16x128xf32>
      tpu.vector_store %arg9[%c0_17, %c0_18], %32 {strides = array<i32>} : memref<16x128xf32, #tpu.memory_space<vmem>>, vector<16x128xf32>,
    } else {
    }
    %c1_i32 = arith.constant 1 : i32
    %8 = arith.cmpi eq, %arg1, %c1_i32 : i32
    %9 = arith.extui %8 : i1 to i32
    %c0_i32_3 = arith.constant 0 : i32
    %10 = arith.cmpi ne, %9, %c0_i32_3 : i32
    scf.if %10 {
      %c0 = arith.constant 0 : index
      %c0_4 = arith.constant 0 : index
      %11 = vector.load %arg9[%c0, %c0_4] : memref<16x128xf32, #tpu.memory_space<vmem>>, vector<16x128xf32>
      %c0_5 = arith.constant 0 : index
      %c0_6 = arith.constant 0 : index
      %12 = vector.load %arg8[%c0_5, %c0_6] : memref<16x128xf32, #tpu.memory_space<vmem>>, vector<16x128xf32>
      tpu.vector_store %arg8[%c0_5, %c0_6], %11 {strides = array<i32>} : memref<16x128xf32, #tpu.memory_space<vmem>>, vector<16x128xf32>,
    } else {
    }
    return
  }
  func.func @transform_0(%arg0: i32, %arg1: i32, %arg2: memref<9xi32, #tpu.memory_space<smem>>, %arg3: memref<9xi32, #tpu.memory_space<smem>>) -> (i32, i32) {
    %c0_i32 = arith.constant 0 : i32
    %c0_i32_0 = arith.constant 0 : i32
    return %arg0, %c0_i32 : i32, i32
  }
  func.func @transform_1(%arg0: i32, %arg1: i32, %arg2: memref<9xi32, #tpu.memory_space<smem>>, %arg3: memref<9xi32, #tpu.memory_space<smem>>) -> (i32, i32) {
    %c0_i32 = arith.constant 0 : i32
    %c0_i32_0 = arith.constant 0 : i32
    return %arg0, %c0_i32 : i32, i32
  }
  func.func @transform_2(%arg0: i32, %arg1: i32, %arg2: memref<9xi32, #tpu.memory_space<smem>>, %arg3: memref<9xi32, #tpu.memory_space<smem>>) -> (i32, i32, i32) {
    %0 = arith.index_cast %arg0 : i32 to index
    %1 = memref.load %arg2[%0] : memref<9xi32, #tpu.memory_space<smem>>
    %c0_i32 = arith.constant 0 : i32
    %c0_i32_0 = arith.constant 0 : i32
    return %1, %c0_i32, %arg1 : i32, i32, i32
  }
  func.func @transform_3(%arg0: i32, %arg1: i32, %arg2: memref<9xi32, #tpu.memory_space<smem>>, %arg3: memref<9xi32, #tpu.memory_space<smem>>) -> (i32, i32, i32) {
    %0 = arith.index_cast %arg0 : i32 to index
    %1 = memref.load %arg2[%0] : memref<9xi32, #tpu.memory_space<smem>>
    %c0_i32 = arith.constant 0 : i32
    %c0_i32_0 = arith.constant 0 : i32
    return %1, %arg1, %c0_i32 : i32, i32, i32
  }
  func.func @transform_4(%arg0: i32, %arg1: i32, %arg2: memref<9xi32, #tpu.memory_space<smem>>, %arg3: memref<9xi32, #tpu.memory_space<smem>>) -> (i32, i32) {
    %c0_i32 = arith.constant 0 : i32
    %c0_i32_0 = arith.constant 0 : i32
    return %arg0, %c0_i32 : i32, i32
  }
}

</mosaic_0001>

<bundles_post_ra>
// kernel: tpu_custom_call.1
= control target key start
LH: loop header
LB: loop body
LE: loop exit
PB: predicated region body
PF: predicated region fallthrough
CT: control target
= control target key end

     0   :  { %s1768_s0 = inlined_call_operand.vmem [shape: s32[9], index: 0, kind: input, shape index: {}]   ;;  %s1769_s2 = inlined_call_operand.vmem [shape: bf16[144,128], index: 2, kind: input, shape index: {}]   ;;  %s1770_s3 = inlined_call_operand.vmem [shape: f32[144,1], index: 3, kind: input, shape index: {}]   ;;  %s1771_s4 = inlined_call_operand.hbm [shape: bf16[8,128,512], index: 4, kind: input, shape index: {}]   ;;  %s1772_s5 = inlined_call_operand.hbm [shape: bf16[8,256,128], index: 5, kind: input, shape index: {}]   ;;  %s1773_s6 = inlined_call_operand.hbm [shape: f32[144,128], index: 6, kind: output, shape index: {}]   ;;  %s1774_s1 = inlined_call_operand.vmem [shape: s32[9], index: 1, kind: input, shape index: {}]  }
   0x1   :  { %1786 = sst [smem:[#allocation29_spill]] %s1769_s2  ;;  %s11_s23 = sshll.u32 %s1768_s0, 4  ;;  %s12_s23 = int_to_ptr.vmem [resolvable:$true] %s11_s23 }
   0x2   :  { %1787 = sst [smem:[#allocation30_spill]] %s1770_s3  ;;  %s15_s26 = sshll.u32 %s1774_s1, 4  ;;  %s16_s26 = int_to_ptr.vmem [resolvable:$true] %s15_s26 }
   0x3   :  { %1788 = sst [smem:[#allocation31_spill]] %s1771_s4  ;;  %s1082_s27 = scalar_lea.vmem %s12_s23, 16 }
   0x4   :  { %1789 = sst [smem:[#allocation32_spill]] %s1772_s5  ;;  %p1083_p0 = scmp.ne.s32.totalorder %s12_s23, %s1082_s27 }
   0x5   :  { %1790 = sst [smem:[#allocation33_spill]] %s1773_s6  ;;  %p1087_p1 = scmp.lt.s32.totalorder %s12_s23, %s12_s23 }
   0x6   :  { %p1088_p2 = scmp.lt.s32.totalorder %s1082_s27, %s1082_s27 }
   0x8   :  { %p1089_p3 = por %p1088_p2, %p1087_p1 }
   0xa   :  { %p1090_p4 = pnand %p1089_p3, %p1083_p0 }
   0xc   :  { %1093 = shalt.err (!%p1090_p4)  }
   0xd   :  { %s1314_s28 = smov [#allocation4]   ;;  %s1094_s29 = scalar_lea.vmem %s16_s26, 16 }
   0xe   :  { %14 = dma.vmem_to_smem %s12_s23, 16, %s1314_s28, [#allocation3] }
   0xf   :  { %p1095_p5 = scmp.ne.s32.totalorder %s16_s26, %s1094_s29  ;;  %p1099_p6 = scmp.lt.s32.totalorder %s16_s26, %s16_s26 }
  0x10   :  { %p1100_p7 = scmp.lt.s32.totalorder %s1094_s29, %s1094_s29 }
  0x12   :  { %p1101_p8 = por %p1100_p7, %p1099_p6 }
  0x14   :  { %p1102_p9 = pnand %p1101_p8, %p1095_p5 }
  0x16   :  { %1105 = shalt.err (!%p1102_p9)  }
  0x17   :  { %s1315_s0 = smov [#allocation5]  }
  0x18   :  { %18 = dma.vmem_to_smem %s16_s26, 16, %s1315_s0, [#allocation3] }
  0x19   :  { %1244 = dma.done.wait [#allocation3], 32 }
  0x1a   :  { %1245 = vsyncadd [#allocation3], 4294967264 }
  0x1b   :  { %20 = sfence }
  0x1c   :  { %21 = vsyncpa [#allocation7], 0 }
  0x1d   :  { %23 = vsyncpa [#allocation7 + $0x1], 0 }
  0x1e   :  { %24 = vsyncpa [#allocation10], 0 }
  0x1f   :  { %26 = vsyncpa [#allocation10 + $0x1], 0 }
  0x20   :  { %27 = vsyncpa [#allocation8], 0 }
  0x21   :  { %29 = vsyncpa [#allocation8 + $0x1], 0  ;;  %s1371_s1 = smov 0   ;;  %s1373_s30 = smov 0  }
  0x22   :  { %s1375_s7 = smov 0   ;;  %s1377_s8 = smov 0  }
  0x23   :  { %s1379_s9 = smov 0   ;;  %s1381_s10 = smov 0  }
  0x24   :  { %s1383_s11 = smov 0   ;;  %s1385_s12 = smov 0  }
  0x25   :  { %s1387_s13 = smov 0   ;;  %s1389_s14 = smov 0  }
  0x26   :  { %s1391_s15 = smov 0   ;;  %s1393_s16 = smov 0  }
  0x27   :  { %s1395_s17 = smov 0   ;;  %s1397_s18 = smov 0  }
  0x28 LB: > { %1791 = sst [smem:[#allocation20_spill]] %s1260_s1  ;;  %s44_s19 = sadd.s32 1, %s1304_s16  ;;  %s1312_s18 = sphi %s1397_s18, %s35_s18   ;;  %s1308_s17 = sphi %s1395_s17, %s1838_s17   ;;  %s1304_s16 = sphi %s1393_s16, %s1848_s16   ;;  %s1300_s15 = sphi %s1391_s15, %s1836_s15   ;;  %s1296_s14 = sphi %s1389_s14, %s1847_s14   ;;  %s1292_s13 = sphi %s1387_s13, %s1835_s13   ;;  %s1288_s12 = sphi %s1385_s12, %s1846_s12   ;;  %s1284_s11 = sphi %s1383_s11, %s1845_s11   ;;  %s1280_s10 = sphi %s1381_s10, %s1844_s10   ;;  %s1276_s9 = sphi %s1379_s9, %s1843_s9   ;;  %s1272_s8 = sphi %s1377_s8, %s1842_s8   ;;  %s1268_s7 = sphi %s1375_s7, %s1841_s7   ;;  %s1264_s30 = sphi %s1373_s30, %s1840_s30   ;;  %s1260_s1 = sphi %s1371_s1, %s1839_s1  }
  0x29   : > { %1792 = sst [smem:[#allocation21_spill]] %s1292_s13  ;;  %p45_p10 = scmp.ge.s32.totalorder %s44_s19, 2 }
  0x2a   : > { %1793 = sst [smem:[#allocation22_spill]] %s1296_s14  ;;  %s47_s20 = sadd.s32 1, %s1308_s17 }
  0x2b   : > { %1794 = sst [smem:[#allocation23_spill]] %s1300_s15  ;;  %s110_s22 = sadd.s32 1, %s1292_s13 }
  0x2c   : > { %1795 = sst [smem:[#allocation24_spill]] %s1308_s17  ;;  %s1850_s19 = smov (%p45_p10, %s44_s19), 0 }
  0x2d   : > { %s103_s21 = sld [smem:[#allocation4 + %s1308_s17]]  ;;  %s1852_s20 = smov (!%p45_p10, %s47_s20), %s1308_s17 }
  0x2e   : > { %1796 = sst [smem:[#allocation25_spill]] %s1850_s19  ;;  %p117_p11 = scmp.ne.s32.totalorder %s1292_s13, %s1288_s12 }
  0x2f   : > { %p1779_p12 = scmp.eq.s32.totalorder %s1312_s18, 0  ;;  %p49_p13 = scmp.ge.s32.totalorder %s1852_s20, 9 }
  0x30   : > { %s1453_s23 = ssub.s32 %s1304_s16, %s1850_s19  ;;  %s221_s25 = sand.u32 1, %s1292_s13  }
  0x31   : > { %s1854_s20 = smov (%p49_p13, %s1852_s20), 0  ;;  %p1461_p1 = por %p1779_p12, %p117_p11 }
  0x32   : > { %1797 = sst [smem:[#allocation26_spill]] %s1854_s20  ;;  %s163_s27 = ssub.s32 %s1308_s17, %s1854_s20 }
  0x33   : > { %s104_s26 = sld [smem:[#allocation4 + %s1854_s20]]  ;;  %p1469_p2 = scmp.eq.s32.totalorder %s163_s27, 0 }
  0x34   : > { %p1778_p3 = scmp.lt.s32.totalorder %s1312_s18, 18  ;;  %s807_s29 = sshll.u32 %s221_s25, 7 }
  0x35   : > { %s1799_s28 = scalar_select %p1469_p2, 1, 0 }
  0x36   : > { %p1478_p4 = pnand %p1778_p3, %p1461_p1  ;;  %s808_s3 = sshll.u32 %s1304_s16, 1 }
  0x37   : > { %s888_s19 = scalar_select %p1461_p1, [#allocation4], [#allocation12] }
  0x38   : > { %s889_s6 = scalar_select %p1461_p1, %s1308_s17, 0 }
  0x39   : > { %s105_s14 = ssub.s32 %s103_s21, %s104_s26  ;;  %s225_s2 = scalar_lea.vmem [#allocation6], %s807_s29 }
  0x3a   : > { %s107_s27 = sor.u32 %s1453_s23, %s105_s14  ;;  %s235_s15 = sshll.u32 %s225_s2, 4  ;;  %s1496_s15 = int_to_ptr.vmem [resolvable:$true] %s235_s15 }
  0x3b   : > { %p108_p5 = scmp.eq.s32.totalorder %s107_s27, 0  ;;  %s1856_s19 = smov (!%p1778_p3, %s888_s19), [#allocation14] }
  0x3c   : > { %s1858_s6 = smov (!%p1778_p3, %s889_s6), 0  ;;  %p815_p6 = scmp.ge.s32.totalorder %s1312_s18, 1 }
  0x3d   : > { %s1492_s5 = scalar_select %p108_p5, %s1292_s13, %s110_s22  }
  0x3e   : > { %s226_s1 = sld [smem:[%s1856_s19 + %s1858_s6]]  ;;  %p267_p7 = scmp.lt.s32.totalorder %s1312_s18, 19 }
  0x3f   : > { %1801 = sst [smem:[#allocation27_spill]] %s1492_s5  ;;  %s1509_s22 = scalar_lea.sflag [#allocation7], %s221_s25 }
  0x40   : > { %p1500_p8 = pnand %p815_p6, %p267_p7  ;;  %s1803_s4 = sld [smem:[#allocation31_spill]] }
  0x41   : > { %p1108_p10 = pneg %p1478_p4 }
  0x42   : > { %s1802_s24 = scalar_select %p1500_p8, 1, 0 }
  0x44   : > { %s809_s14 = sshll.u32 %s226_s1, 6 }
  0x45   : > { %s232_s21 = sadd.s32 %s809_s14, %s808_s3 }
  0x46   : > { %s810_s2 = sshll.u32 %s232_s21, 6  ;;  %s1111_s3 = scalar_lea.hbm %s1803_s4, 32768 }
  0x47   : > { %s1507_s27 = scalar_lea.hbm %s1803_s4, %s810_s2 }
  0x48   : > { %s1106_s6 = scalar_lea.hbm %s1507_s27, 2048  ;;  %p1112_p1 = scmp.lt.s32.totalorder %s1507_s27, %s1803_s4 }
  0x49   : > { %p1107_p9 = scmp.ne.s32.totalorder %s1507_s27, %s1106_s6  ;;  %p1113_p5 = scmp.lt.s32.totalorder %s1111_s3, %s1106_s6 }
  0x4b   : > { %p1109_p11 = pnand %p1108_p10, %p1107_p9  ;;  %p1114_p6 = por %p1113_p5, %p1112_p1 }
  0x4d   : > { %p1110_p13 = pneg %p1109_p11 }
  0x4f   : > { %p1115_p7 = pnand %p1114_p6, %p1110_p13 }
  0x51   : > { %1118 = shalt.err (!%p1115_p7)
}
  0x52   : > { %s1119_s25 = scalar_lea.vmem %s1496_s15, 2048  ;;  %s1316_s2 = smov [#allocation6]  }
  0x53   : > { %p1120_p3 = scmp.ne.s32.totalorder %s1496_s15, %s1119_s25  ;;  %s1124_s26 = sshll.u32 %s1316_s2, 4  ;;  %s1125_s26 = int_to_ptr.vmem [resolvable:$false] %s1124_s26 }
  0x54   : > { %s1126_s29 = scalar_lea.vmem %s1125_s26, 4096  ;;  %p1127_p11 = scmp.lt.s32.totalorder %s1496_s15, %s1125_s26 }
  0x55   : > { %p1122_p12 = pnand %p1120_p3, %p1108_p10  ;;  %p1128_p0 = scmp.lt.s32.totalorder %s1126_s29, %s1119_s25 }
  0x57   : > { %p1123_p9 = pneg %p1122_p12  ;;  %p1129_p8 = por %p1128_p0, %p1127_p11 }
  0x59   : > { %p1130_p2 = pnand %p1129_p8, %p1123_p9 }
  0x5b   : > { %1133 = shalt.err (!%p1130_p2)
}
  0x5c   : > { %s1317_s6 = smov 256   ;;  %s1318_s19 = smov 128  }
  0x5d   : > { %s1319_s1 = smov 8   ;;  %s1804_s3 = sld [smem:[#allocation20_spill]] }
  0x5e   : > { %903 = dma.hbm_to_vmem [thread:$0]  (!%p1478_p4), %s1507_s27, 2048, %s1496_s15, %s1509_s22, %s1317_s6, %s1318_s19, %s1319_s1  }
  0x5f   : > { %s803_s14 = sadd.s32 4294967295, %s1312_s18   ;;  %s804_s21 = sadd.s32 4294967294, %s1312_s18  }
  0x60   : > { %p124_p12 = scmp.eq.s32.totalorder %s803_s14, 0  ;;  %s133_s25 = sld [smem:[#allocation4 + %s1308_s17]] }
  0x61   : > { %p1805_p0 = scmp.ne.s32.totalorder %s1288_s12, %s1284_s11  ;;  %s134_s26 = sld [smem:[#allocation4 + %s1854_s20]] }
  0x62   : > { %s140_s29 = sadd.s32 1, %s1280_s10  ;;  %p153_p3 = scmp.ne.s32.totalorder %s1276_s9, %s1272_s8 }
  0x63   : > { %p1536_p2 = por %p124_p12, %p1805_p0  ;;  %p147_p8 = scmp.ne.s32.totalorder %s1280_s10, %s1276_s9 }
  0x64   : > { %s166_s15 = sadd.s32 1, %s1268_s7  ;;  %p1547_p4 = por %p153_p3, %p124_p12 }
  0x65   : > { %s1806_s2 = scalar_select %p1536_p2, 1, 0 }
  0x66   : > { %s1807_s0 = scalar_select %p1547_p4, 1, 0 }
  0x67   : > { %p176_p10 = scmp.ne.s32.totalorder %s1268_s7, %s1264_s30  ;;  %p1808_p13 = scmp.ne.s32.totalorder %s1799_s28, 0 }
  0x68   : > { %p177_p1 = scmp.eq.s32.totalorder %s803_s14, 17  ;;  %p182_p5 = scmp.ne.s32.totalorder %s1264_s30, %s1804_s3 }
  0x69   : > { %s1556_s11 = scalar_select %p1808_p13, %s1268_s7, %s166_s15  }
  0x6a   : > { %s135_s27 = ssub.s32 %s133_s25, %s134_s26  ;;  %p183_p6 = scmp.eq.s32.totalorder %s804_s21, 17 }
  0x6b   : > { %s137_s8 = sor.u32 %s135_s27, %s1453_s23  ;;  %p1561_p7 = por %p177_p1, %p176_p10 }
  0x6c   : > { %p138_p9 = scmp.eq.s32.totalorder %s137_s8, 0  ;;  %p1565_p11 = por %p183_p6, %p182_p5 }
  0x6d   : > { %s1809_s22 = scalar_select %p1561_p7, 1, 0 }
  0x6e   : > { %s1810_s6 = scalar_select %p1565_p11, 1, 0 }
  0x6f   : > { %p1811_p12 = scmp.eq.s32.totalorder %s1312_s18, 0  ;;  %s245_s28 = sand.u32 1, %s1280_s10  }
  0x70   : > { %s1576_s19 = scalar_select %p138_p9, %s1280_s10, %s140_s29  }
  0x71   : > { %p149_p0 = por %p147_p8, %p1811_p12  ;;  %s811_s1 = sshll.u32 %s245_s28, 6 }
  0x72   : > { %1812 = sst [smem:[#allocation28_spill]] %s1576_s19  ;;  %p1813_p3 = scmp.lt.s32.totalorder %s1312_s18, 18 }
  0x73   : > { %s891_s3 = scalar_select %p149_p0, [#allocation4], [#allocation13] }
  0x74   : > { %p1580_p13 = pnand %p1813_p3, %p149_p0  ;;  %p1815_p10 = pmov %p1813_p3 }
  0x75   : > { %s892_s14 = scalar_select %p149_p0, %s1308_s17, 0 }
  0x76   : > { %s1860_s3 = smov (!%p1815_p10, %s891_s3), [#allocation15]  ;;  %p1816_p1 = pmov %p1813_p3 }
  0x77   : > { %s249_s25 = scalar_lea.vmem [#allocation9], %s811_s1  ;;  %s812_s15 = sshll.u32 %s1304_s16, 4 }
  0x78   : > { %s1862_s14 = smov (!%p1816_p1, %s892_s14), 0  ;;  %s259_s26 = sshll.u32 %s249_s25, 4  ;;  %s1590_s26 = int_to_ptr.vmem [resolvable:$true] %s259_s26 }
  0x79   : > { %s250_s21 = sld [smem:[%s1860_s3 + %s1862_s14]]  ;;  %s1597_s17 = scalar_lea.sflag [#allocation10], %s245_s28 }
  0x7a   : > { %s1817_s5 = sld [smem:[#allocation32_spill]]  ;;  %p1136_p5 = pneg %p1580_p13 }
  0x7f   : > { %s813_s29 = sshll.u32 %s250_s21, 5 }
  0x80   : > { %s256_s27 = sadd.s32 %s813_s29, %s812_s15  ;;  %s1139_s14 = scalar_lea.hbm %s1817_s5, 16384 }
  0x81   : > { %s814_s8 = sshll.u32 %s256_s27, 6 }
  0x82   : > { %s1595_s13 = scalar_lea.hbm %s1817_s5, %s814_s8 }
  0x83   : > { %s1134_s19 = scalar_lea.hbm %s1595_s13, 1024  ;;  %p1140_p12 = scmp.lt.s32.totalorder %s1595_s13, %s1817_s5 }
  0x84   : > { %p1135_p8 = scmp.ne.s32.totalorder %s1595_s13, %s1134_s19  ;;  %p1141_p0 = scmp.lt.s32.totalorder %s1139_s14, %s1134_s19 }
  0x86   : > { %p1137_p6 = pnand %p1136_p5, %p1135_p8  ;;  %p1142_p3 = por %p1141_p0, %p1140_p12 }
  0x88   : > { %p1138_p9 = pneg %p1137_p6 }
  0x8a   : > { %p1143_p10 = pnand %p1142_p3, %p1138_p9 }
  0x8c   : > { %1146 = shalt.err (!%p1143_p10)
}
  0x8d   : > { %s1147_s4 = scalar_lea.vmem %s1590_s26, 1024  ;;  %s1320_s20 = smov [#allocation9]  }
  0x8e   : > { %p1148_p1 = scmp.ne.s32.totalorder %s1590_s26, %s1147_s4  ;;  %s1152_s28 = sshll.u32 %s1320_s20, 4  ;;  %s1153_s28 = int_to_ptr.vmem [resolvable:$false] %s1152_s28 }
  0x8f   : > { %s1154_s15 = scalar_lea.vmem %s1153_s28, 2048  ;;  %p1155_p6 = scmp.lt.s32.totalorder %s1590_s26, %s1153_s28 }
  0x90   : > { %p1150_p11 = pnand %p1148_p1, %p1136_p5  ;;  %p1156_p7 = scmp.lt.s32.totalorder %s1154_s15, %s1147_s4 }
  0x92   : > { %p1151_p8 = pneg %p1150_p11  ;;  %p1157_p4 = por %p1156_p7, %p1155_p6 }
  0x94   : > { %p1158_p2 = pnand %p1157_p4, %p1151_p8 }
  0x96   : > { %1161 = shalt.err (!%p1158_p2)
}
  0x97   : > { %s1321_s19 = smov 64   ;;  %s1322_s29 = smov 4  }
  0x98   : > { %908 = dma.hbm_to_vmem [thread:$0]  (!%p1580_p13), %s1595_s13, 1024, %s1590_s26, %s1597_s17, %s1321_s19, %s1321_s19, %s1322_s29  }
  0x99   : > { %p1818_p5 = scmp.ne.s32.totalorder %s1802_s24, 0 }
  0x9a   : > { %s273_s27 = sand.u32 (!%p1818_p5), 1, %s1288_s12   ;;  %p1819_p4 = scmp.ne.s32.totalorder (!%p1818_p5), %s1806_s2, 0 }
  0x9b   : > { %271 = sbr.rel (%p1818_p5) target bundleno = 716 (0x2cc), region = 36  ;;  %s816_s8 = sshll.u32 (!%p1818_p5), %s273_s27, 7 }
  0x9c   : > { %s274_s1 = scalar_lea.sflag (!%p1818_p5), [#allocation7], %s273_s27  ;;  %s1621_s3 = scalar_lea.vmem (!%p1818_p5), [#allocation6], %s816_s8 }
  0xa0   : > { %1247 = dma.done.wait (%p1819_p4), %s274_s1, 2048  }
  0xa1   : > { %1249 = vsyncadd (%p1819_p4), %s274_s1, 4294965248  ;;  %s282_s14 = sand.u32 1, %s1276_s9   ;;  %p1820_p2 = scmp.ne.s32.totalorder %s1807_s0, 0 }
  0xa2   : > { %s817_s23 = sshll.u32 %s282_s14, 6  ;;  %s283_s13 = scalar_lea.sflag [#allocation10], %s282_s14 }
  0xa3   : > { %s1628_s17 = scalar_lea.vmem [#allocation9], %s817_s23 }
  0xa4   : > { %1251 = dma.done.wait (%p1820_p2), %s283_s13, 1024  }
  0xa5   : > { %1253 = vsyncadd (%p1820_p2), %s283_s13, 4294966272  ;;  %s1821_s24 = sld [smem:[#allocation23_spill]]  ;;  %s323_s26 = sand.u32 1, %s1264_s30  }
  0xa6   : > { %s818_s2 = sshll.u32 %s323_s26, 4  ;;  %s1822_s15 = sld [smem:[#allocation29_spill]] }
  0xa7   : > { %s1823_s0 = sld [smem:[#allocation30_spill]]  ;;  %s1648_s1 = scalar_lea.vmem [#allocation11], %s818_s2 }
  0xa8   : > { %s1824_s14 = sld [smem:[#allocation22_spill]] }
  0xab   : > { %s819_s21 = sshll.u32 %s1821_s24, 1 }
  0xac   : > { %p327_p7 = scmp.lt.s32.totalorder %s819_s21, 17 }
  0xae   : > { %s1864_s21 = smov (!%p327_p7, %s819_s21), 17  ;;  %p823_p11 = scmp.ne.s32.totalorder %s1824_s14, 0 }
  0xaf   : > { %s820_s25 = sshll.u32 %s1864_s21, 2  ;;  %s822_s4 = sshll.u32 %s1864_s21, 3 }
  0xb0   : > { %s1641_s19 = scalar_lea.vmem %s1822_s15, %s820_s25  ;;  %s1646_s8 = scalar_lea.vmem %s1823_s0, %s822_s4 }
  0xb1   : > { %347 = sbr.rel (%p823_p11) target bundleno = 184 (0xb8), region = 48 }
  0xb6   : > { %v1323_v0 = vmov 0.0  }
  0xb7   : > { %348 = vst [vmem:[#allocation2] sm:$0xff] %v1323_v0  ;;  %349 = vst [vmem:[#allocation2 + $0x8] sm:$0xff] %v1323_v0 }
  0xb8 PF: > { %s1825_s23 = sld [smem:[#allocation23_spill]] }
  0xbe   : > { %s350_s13 = sld [smem:[#allocation5 + %s1825_s23]] }
  0xc4   : > { %p824_p13 = scmp.le.s32.totalorder %s350_s13, 0 }
  0xc6   : > { %354 = sbr.rel (%p824_p13) target bundleno = 674 (0x2a2), region = 52 }
  0xcb   : > { %v1041_v1 = vld [vmem:[%s1621_s3 + $0x74] ss:$8 sps:$4 sm:$0xff]   ;;  %v1043_v2 = vld [vmem:[%s1621_s3 + $0x70] ss:$8 sps:$4 sm:$0xff]   ;;  %v1324_v3 = vmov 0   ;;  %v1325_v22 = vmov 0.0  }
  0xcc   : > { %491 = vmatprep.mubr.bf16.mxu0 %v1324_v3  ;;  %1040 = vset.pattern.permute.xlu0 %v1324_v3  ;;  %v1044_v4 = vld [vmem:[%s1621_s3 + $0x64] ss:$8 sps:$4 sm:$0xff]   ;;  %v1046_v5 = vld [vmem:[%s1621_s3 + $0x60] ss:$8 sps:$4 sm:$0xff]   ;;  %v1047_v6 = vld [vmem:[%s1621_s3 + $0x54] ss:$8 sps:$4 sm:$0xff]  }
  0xcd   : > { %459 = vmatprep.subr.bf16.mxu0 %v1041_v1  ;;  %v1049_v7 = vld [vmem:[%s1621_s3 + $0x50] ss:$8 sps:$4 sm:$0xff]   ;;  %v1050_v8 = vld [vmem:[%s1621_s3 + $0x44] ss:$8 sps:$4 sm:$0xff]   ;;  %v1052_v9 = vld [vmem:[%s1621_s3 + $0x40] ss:$8 sps:$4 sm:$0xff]   ;;  %868 = vmatprep.subr.bf16.mxu1 %v1325_v22 }
  0xce   : > { %460 = vmatpush1.bf16.msra.mxu0 %v1043_v2  ;;  %v1053_v10 = vld [vmem:[%s1621_s3 + $0x34] ss:$8 sps:$4 sm:$0xff]   ;;  %v1055_v13 = vld [vmem:[%s1621_s3 + $0x30] ss:$8 sps:$4 sm:$0xff]   ;;  %v1056_v14 = vld [vmem:[%s1621_s3 + $0x24] ss:$8 sps:$4 sm:$0xff]  }
  0xcf   : > { %461 = vmatprep.subr.bf16.mxu0 %v1044_v4  ;;  %v518_v11 = vld [vmem:[%s1646_s8] sm:$0xff]  ;;  %v519_v12 = vld [vmem:[%s1646_s8 + $0x8] sm:$0xff]  ;;  %v1058_v15 = vld [vmem:[%s1621_s3 + $0x20] ss:$8 sps:$4 sm:$0xff]   ;;  %vm1326_vm0 = vmmov 0  }
  0xd0   : > { %522 = vperm.xlu0 %1040, %v518_v11   ;;  %v1059_v16 = vld [vmem:[%s1621_s3 + $0x14] ss:$8 sps:$4 sm:$0xff]   ;;  %v1061_v17 = vld [vmem:[%s1621_s3 + $0x10] ss:$8 sps:$4 sm:$0xff]   ;;  %v1062_v18 = vld [vmem:[%s1621_s3 + $0x4] ss:$8 sps:$4 sm:$0xff]   ;;  %884 = vmatprep.mubr.msk.bf16.mxu1 %vm1326_vm0, %v1325_v22 }
  0xd1   : > { %v1064_v19 = vld [vmem:[%s1621_s3] ss:$8 sps:$4 sm:$0xff]   ;;  %v1065_v20 = vld [vmem:[%s1641_s19] sm:$0xff]   ;;  %v1066_v21 = vld [vmem:[%s1628_s17 + $0x38] sm:$0xff]  }
  0xd2   : > { %462 = vmatpush1.bf16.msra.mxu0 %v1046_v5  ;;  %869 = vmatpush3.bf16.msra.mxu1 %v1066_v21  ;;  %v1067_v23 = vld [vmem:[%s1628_s17 + $0x30] sm:$0xff]   ;;  %v1068_v24 = vld [vmem:[%s1628_s17 + $0x28] sm:$0xff]   ;;  %v1069_v25 = vld [vmem:[%s1628_s17 + $0x20] sm:$0xff]  }
  0xd3   : > { %463 = vmatprep.subr.bf16.mxu0 %v1047_v6  ;;  %870 = vmatprep.subr.bf16.mxu1 %v1325_v22  ;;  %v1070_v26 = vld [vmem:[%s1628_s17 + $0x18] sm:$0xff]   ;;  %v1071_v27 = vld [vmem:[%s1628_s17 + $0x10] sm:$0xff]   ;;  %v1072_v28 = vld [vmem:[%s1628_s17 + $0x8] sm:$0xff]  }
  0xd4   : > { %527 = vperm.xlu0 %1040, %v519_v12   ;;  %v1073_v29 = vld [vmem:[%s1628_s17] sm:$0xff]   ;;  %v532_v51 = vld [vmem:[#allocation2] sm:$0xff]  ;;  %v533_v55 = vld [vmem:[#allocation2 + $0x8] sm:$0xff] }
  0xd6   : > { %464 = vmatpush1.bf16.msra.mxu0 %v1049_v7  ;;  %871 = vmatpush3.bf16.msra.mxu1 %v1067_v23 }
  0xd7   : > { %465 = vmatprep.subr.bf16.mxu0 %v1050_v8  ;;  %872 = vmatprep.subr.bf16.mxu1 %v1325_v22 }
  0xda   : > { %466 = vmatpush1.bf16.msra.mxu0 %v1052_v9  ;;  %873 = vmatpush3.bf16.msra.mxu1 %v1068_v24 }
  0xdb   : > { %467 = vmatprep.subr.bf16.mxu0 %v1053_v10  ;;  %874 = vmatprep.subr.bf16.mxu1 %v1325_v22 }
  0xde   : > { %468 = vmatpush1.bf16.msra.mxu0 %v1055_v13  ;;  %875 = vmatpush3.bf16.msra.mxu1 %v1069_v25 }
  0xdf   : > { %469 = vmatprep.subr.bf16.mxu0 %v1056_v14  ;;  %876 = vmatprep.subr.bf16.mxu1 %v1325_v22 }
  0xe2   : > { %470 = vmatpush1.bf16.msra.mxu0 %v1058_v15  ;;  %877 = vmatpush3.bf16.msra.mxu1 %v1070_v26 }
  0xe3   : > { %471 = vmatprep.subr.bf16.mxu0 %v1059_v16  ;;  %878 = vmatprep.subr.bf16.mxu1 %v1325_v22 }
  0xe6   : > { %472 = vmatpush1.bf16.msra.mxu0 %v1061_v17  ;;  %879 = vmatpush3.bf16.msra.mxu1 %v1071_v27 }
  0xe7   : > { %473 = vmatprep.subr.bf16.mxu0 %v1062_v18  ;;  %880 = vmatprep.subr.bf16.mxu1 %v1325_v22 }
  0xea   : > { %474 = vmatpush1.bf16.msra.mxu0 %v1064_v19  ;;  %881 = vmatpush3.bf16.msra.mxu1 %v1072_v28 }
  0xeb   : > { %882 = vmatprep.subr.bf16.mxu1 %v1325_v22 }
  0xed   : > { %492 = vmatmul.mubr.bf16.vlgmr.msra.gmra.mxu0 %v1065_v20 }
  0xee   : > { %883 = vmatpush3.bf16.msra.mxu1 %v1073_v29 }
 0x14b   : > { %v523_v41 = vpop.permute.xlu0 %522 }
 0x14f   : > { %v528_v47 = vpop.permute.xlu0 %527 }
 0x1ad   : > { %v493_v30 = vpop.f32.mrf.mxu0 }
 0x1ae   : > { %v842_v31 = vmul.f32 -1.442695, %v493_v30 }
 0x1af   : > { %v495_v32 = vpop.f32.mrf.mxu0 }
 0x1b0   : > { %1074 = vpow2.f32 %v842_v31 }
 0x1b1   : > { %v497_v33 = vpop.f32.mrf.mxu0 }
 0x1b2   : > { %v843_v34 = vmul.f32 -1.442695, %v497_v33 }
 0x1b3   : > { %v499_v45 = vpop.f32.mrf.mxu0 }
 0x1b4   : > { %1076 = vpow2.f32 %v843_v34 }
 0x1bd   : > { %v1075_v35 = vpop.eup %1074 }
 0x1be   : > { %v508_v36 = vadd.f32 1.0, %v1075_v35 }
 0x1c0   : > { %1078 = vrcp.f32 %v508_v36 }
 0x1c1   : > { %v1077_v37 = vpop.eup %1076 }
 0x1c2   : > { %v509_v38 = vadd.f32 1.0, %v1077_v37 }
 0x1c4   : > { %1080 = vrcp.f32 %v509_v38 }
 0x1cd   : > { %v1079_v39 = vpop.eup %1078 }
 0x1ce   : > { %v514_v40 = vmul.f32 %v1079_v39, %v493_v30 }
 0x1d0   : > { %v516_v43 = vmul.f32 %v514_v40, %v495_v32 }
 0x1d1   : > { %v1081_v42 = vpop.eup %1080 }
 0x1d2   : > { %v515_v44 = vmul.f32 %v1081_v42, %v497_v33  ;;  %v530_v48 = vmul.f32 %v523_v41, %v516_v43 }
 0x1d4   : > { %v517_v46 = vmul.f32 %v515_v44, %v499_v45 }
 0x1d6   : > { %v531_v49 = vmul.f32 %v528_v47, %v517_v46 }
 0x1d8   : > { %v534_v50 = vpack.c.bf16 %v531_v49, %v530_v48 }
 0x1da   : > { %885 = vmatmul.mubr.bf16.vlgmr.msra.gmra.mxu1 %v534_v50 }
 0x29a   : > { %v633_v52 = vpop.f32.mrf.mxu1 }
 0x29b   : > { %v640_v53 = vadd.f32 %v633_v52, %v532_v51 }
 0x29c   : > { %v886_v54 = vpop.f32.mrf.mxu1 }
 0x29d   : > { %642 = vst [vmem:[#allocation2] sm:$0xff] %v640_v53 }
 0x29e   : > { %v636_v56 = vpop.f32.mrf.mxu1 }
 0x29f   : > { %v641_v57 = vadd.f32 %v636_v56, %v533_v55 }
 0x2a0   : > { %v887_v58 = vpop.f32.mrf.mxu1 }
 0x2a1   : > { %643 = vst [vmem:[#allocation2 + $0x8] sm:$0xff] %v641_v57 }
 0x2a2 PF: > { %s1826_s3 = sld [smem:[#allocation22_spill]] }
 0x2a8   : > { %p852_p9 = scmp.ne.s32.totalorder %s1826_s3, 1 }
 0x2aa   : > { %647 = sbr.rel (%p852_p9) target bundleno = 689 (0x2b1), region = 56 }
 0x2af   : > { %v648_v59 = vld [vmem:[#allocation2] sm:$0xff]  ;;  %v649_v60 = vld [vmem:[#allocation2 + $0x8] sm:$0xff] }
 0x2b0   : > { %650 = vst [vmem:[%s1648_s1] sm:$0xff] %v648_v59  ;;  %651 = vst [vmem:[%s1648_s1 + $0x8] sm:$0xff] %v649_v60 }
 0x2b1 PF: > { %s1827_s17 = sld [smem:[#allocation23_spill]]  ;;  %s666_s20 = sshll.u32 %s1648_s1, 4  ;;  %s1689_s20 = int_to_ptr.vmem [resolvable:$true] %s666_s20 }
 0x2b2   : > { %s1828_s25 = sld [smem:[#allocation33_spill]]  ;;  %s1693_s28 = scalar_lea.sflag [#allocation8], %s323_s26 }
 0x2b3   : > { %s1162_s15 = scalar_lea.vmem %s1689_s20, 256  ;;  %p1829_p0 = scmp.ne.s32.totalorder %s1809_s22, 0 }
 0x2b4   : > { %p1163_p12 = scmp.ne.s32.totalorder %s1689_s20, %s1162_s15  ;;  %s1327_s19 = smov [#allocation11]  }
 0x2b5   : > { %s1166_s29 = sshll.u32 %s1327_s19, 4  ;;  %s1167_s29 = int_to_ptr.vmem [resolvable:$false] %s1166_s29 }
 0x2b6   : > { %p1164_p3 = pnand %p1163_p12, %p1829_p0  ;;  %s1168_s27 = scalar_lea.vmem %s1167_s29, 512 }
 0x2b7   : > { %s858_s24 = sshll.u32 %s1827_s17, 8  ;;  %p1169_p1 = scmp.lt.s32.totalorder %s1689_s20, %s1167_s29 }
 0x2b8   : > { %s1686_s4 = scalar_lea.hbm %s1828_s25, %s858_s24  ;;  %p1165_p10 = pneg %p1164_p3 }
 0x2b9   : > { %p1170_p8 = scmp.lt.s32.totalorder %s1168_s27, %s1162_s15 }
 0x2bb   : > { %p1171_p6 = por %p1170_p8, %p1169_p1 }
 0x2bd   : > { %p1172_p5 = pnand %p1171_p6, %p1165_p10 }
 0x2bf   : > { %1175 = shalt.err (!%p1172_p5)
}
 0x2c0   : > { %s1176_s26 = scalar_lea.hbm %s1686_s4, 256  ;;  %s1180_s1 = scalar_lea.hbm %s1828_s25, 2304 }
 0x2c1   : > { %p1177_p4 = scmp.ne.s32.totalorder %s1686_s4, %s1176_s26  ;;  %p1181_p11 = scmp.lt.s32.totalorder %s1686_s4, %s1828_s25 }
 0x2c2   : > { %p1182_p13 = scmp.lt.s32.totalorder %s1180_s1, %s1176_s26 }
 0x2c3   : > { %p1178_p2 = pnand %p1177_p4, %p1829_p0 }
 0x2c4   : > { %p1183_p9 = por %p1182_p13, %p1181_p11 }
 0x2c5   : > { %p1179_p7 = pneg %p1178_p2 }
 0x2c7   : > { %p1184_p12 = pnand %p1183_p9, %p1179_p7 }
 0x2c9   : > { %1187 = shalt.err (!%p1184_p12)
}
 0x2ca   : > { %s1328_s13 = smov 128   ;;  %s1329_s3 = smov 8  }
 0x2cb   : > { %896 = dma.vmem_to_hbm [thread:$0]  (%p1829_p0), %s1689_s20, 256, %s1686_s4, %s1693_s28, %s1328_s13, %s1328_s13, %s1329_s3  }
 0x2cc PF: > { %s1830_s17 = sld [smem:[#allocation20_spill]]  ;;  %p914_p3 = scmp.ge.s32.totalorder %s1312_s18, 2 }
 0x2cd   : > { %p1831_p10 = scmp.ne.s32.totalorder %s1810_s6, 0 }
 0x2cf   : > { %p910_p1 = pnand %p914_p3, %p1831_p10 }
 0x2d1   : > { %p911_p8 = pneg %p910_p1 }
 0x2d2   : > { %s681_s24 = sand.u32 1, %s1830_s17  }
 0x2d3   : > { %s682_s21 = scalar_lea.sflag [#allocation8], %s681_s24 }
 0x2d4   : > { %1255 = dma.done.wait (%p911_p8), %s682_s21, 256  }
 0x2d5   : > { %1257 = vsyncadd (%p911_p8), %s682_s21, 4294967040  ;;  %s35_s18 = sadd.s32 1, %s1312_s18   ;;  %s1833_s22 = sld [smem:[#allocation28_spill]] }
 0x2d6   : > { %p1721_p6 = scmp.ge.s32.totalorder %s35_s18, 20   ;;  %s1834_s4 = sld [smem:[#allocation21_spill]] }
 0x2d7   : > { %s1835_s13 = sld [smem:[#allocation27_spill]]  ;;  %s1839_s1 = smov %s1264_s30 }
 0x2d8   : > { %s1836_s15 = sld [smem:[#allocation24_spill]]  ;;  %s1840_s30 = smov %s1268_s7 }
 0x2d9   : > { %s1837_s6 = sld [smem:[#allocation25_spill]]  ;;  %s1841_s7 = smov %s1556_s11 }
 0x2da   : > { %s1838_s17 = sld [smem:[#allocation26_spill]]  ;;  %s1842_s8 = smov %s1276_s9 }
 0x2db   : > { %s1843_s9 = smov %s1280_s10  ;;  %s1844_s10 = smov %s1833_s22 }
 0x2dc   : > { %s1845_s11 = smov %s1288_s12  ;;  %s1846_s12 = smov %s1834_s4 }
 0x2dd   : > { %s1847_s14 = smov %s1304_s16  ;;  %34 = sbr.rel (!%p1721_p6) target bundleno = 40 (0x28), region = 112 }
 0x2df   : > { %s1848_s16 = smov %s1837_s6 }
 0x2e2   :  { %687 = vsyncpa [#allocation7], 1 }
 0x2e3   :  { %689 = vsyncpa [#allocation7 + $0x1], 1 }
 0x2e4   :  { %690 = vsyncpa [#allocation10], 1 }
 0x2e5   :  { %692 = vsyncpa [#allocation10 + $0x1], 1 }
 0x2e6   :  { %693 = vsyncpa [#allocation8], 1 }
 0x2e7   :  { %695 = vsyncpa [#allocation8 + $0x1], 1 }

</bundles_post_ra>
